<compile_context>
chip_gen: v5e
topology: v5e:2x2
jax: 0.10.0
libtpu: 0.0.40
codegen_flags: <defaults>
</compile_context>

<pallas_src>
import jax
import jax.numpy as jnp
from jax.experimental import pallas as pl
from jax.experimental.pallas import tpu as pltpu


def _round_up(v, m):
    return (v + m - 1) // m * m


# ---------------------------------------------------------------------------
# Kernels
# ---------------------------------------------------------------------------
def _sage_conv1_kernel(a_ref, invd_ref, xf_ref, xt_ref, w1_ref, b1_ref, h1_ref):
    # mean aggregation: (A_rows @ X_full) * inv_deg   (bf16 MXU, f32 acc)
    agg = jnp.dot(a_ref[...], xf_ref[...], preferred_element_type=jnp.float32)
    agg = agg * invd_ref[...]                       # f32 VPU scale
    # fused neighbor/self matmul: [agg | x_tile] @ [Wn1; Ws1]
    z = jnp.concatenate([agg.astype(jnp.bfloat16), xt_ref[...]], axis=-1)
    h1 = jnp.dot(z, w1_ref[...], preferred_element_type=jnp.float32) + b1_ref[...]
    h1_ref[...] = jnp.maximum(h1, 0.0).astype(h1_ref.dtype)


def _sage_conv2_mlp_kernel(a_ref, invd_ref, hf_ref, ht_ref,
                           w2_ref, b2_ref, w3_ref, b3_ref, w4_ref, b4_ref,
                           o_ref):
    # SAGEConv 2 (mean aggregation, no activation after last conv — PyG style)
    agg = jnp.dot(a_ref[...], hf_ref[...], preferred_element_type=jnp.float32)
    agg = agg * invd_ref[...]
    z = jnp.concatenate([agg.astype(jnp.bfloat16), ht_ref[...]], axis=-1)
    h2 = jnp.dot(z, w2_ref[...], preferred_element_type=jnp.float32) + b2_ref[...]

    # MLP: Linear -> ReLU -> Linear
    m1 = jnp.dot(h2.astype(jnp.bfloat16), w3_ref[...],
                 preferred_element_type=jnp.float32) + b3_ref[...]
    m1 = jnp.maximum(m1, 0.0)
    out = jnp.dot(m1.astype(jnp.bfloat16), w4_ref[...],
                  preferred_element_type=jnp.float32) + b4_ref[...]
    o_ref[...] = out.astype(o_ref.dtype)


# ---------------------------------------------------------------------------
# Wrapper
# ---------------------------------------------------------------------------
def _vmem_limit(step_bytes):
    # 2x for double buffering headroom; clamp to [32 MiB, 64 MiB] (v7x ceiling)
    return int(min(max(2 * int(step_bytes), 32 * 1024 * 1024), 64 * 1024 * 1024))


def graphsage_with_mlp(x, edge_index, params):
    """x: [N, F_in] float32, edge_index: [2, E] int32 (row 0 = src, row 1 = dst)."""
    n, f_in = x.shape
    hidden = params["wn1"].shape[1]
    mlp_hidden = params["w3"].shape[1]
    out_dim = params["w4"].shape[1]

    # --- padded (lane-dense) shapes ---
    f_p = _round_up(f_in, 128)
    h_p = _round_up(hidden, 128)
    m_p = _round_up(mlp_hidden, 128)
    o_p = _round_up(out_dim, 128)
    n_p = _round_up(n, 8)
    tm = min(256, n_p)              # row tile (multiple of 128 when large)
    n_p = _round_up(n_p, tm)
    grid = (n_p // tm,)

    # --- glue (plain JAX): raw adjacency counts + inverse degree ---
    src, dst = edge_index[0], edge_index[1]
    adj = jnp.zeros((n_p, n_p), jnp.float32).at[dst, src].add(1.0)
    inv_deg = 1.0 / jnp.clip(jnp.sum(adj, axis=1, keepdims=True), 1.0, None)
    adj = adj.astype(jnp.bfloat16)          # small counts: exact in bf16

    def pad2(a, r, c, dtype):
        return jnp.zeros((r, c), dtype).at[:a.shape[0], :a.shape[1]].set(
            a.astype(dtype))

    x_p = pad2(x, n_p, f_p, jnp.bfloat16)
    # fused neighbor/self weights: [Wn ; Ws]
    w1 = jnp.concatenate([pad2(params["wn1"], f_p, h_p, jnp.bfloat16),
                          pad2(params["ws1"], f_p, h_p, jnp.bfloat16)], axis=0)
    w2 = jnp.concatenate([pad2(params["wn2"], h_p, h_p, jnp.bfloat16),
                          pad2(params["ws2"], h_p, h_p, jnp.bfloat16)], axis=0)
    w3 = pad2(params["w3"], h_p, m_p, jnp.bfloat16)
    w4 = pad2(params["w4"], m_p, o_p, jnp.bfloat16)
    b1 = pad2(params["b1"], 1, h_p, jnp.float32)
    b2 = pad2(params["b2"], 1, h_p, jnp.float32)
    b3 = pad2(params["b3"], 1, m_p, jnp.float32)
    b4 = pad2(params["b4"], 1, o_p, jnp.float32)

    def row_tile(cols):
        return pl.BlockSpec((tm, cols), lambda i: (i, 0))

    def resident(shape):
        return pl.BlockSpec(shape, lambda i: (0, 0))

    # ---------------- SAGEConv layer 1 ----------------
    step1 = (tm * n_p * 2 + tm * 4 + n_p * f_p * 2 + tm * f_p * 2
             + 2 * f_p * h_p * 2 + h_p * 4 + tm * h_p * 2)
    cost1 = pl.CostEstimate(
        flops=2 * n_p * n_p * f_p + 2 * n_p * (2 * f_p) * h_p,
        transcendentals=0,
        bytes_accessed=int(adj.nbytes + inv_deg.nbytes + 2 * x_p.nbytes
                           + w1.nbytes + b1.nbytes + n_p * h_p * 2))
    h1 = pl.pallas_call(
        _sage_conv1_kernel,
        out_shape=jax.ShapeDtypeStruct((n_p, h_p), jnp.bfloat16),
        grid=grid,
        in_specs=[row_tile(n_p),            # A row block
                  row_tile(1),              # inv_deg
                  resident((n_p, f_p)),     # full x (resident, for aggregation)
                  row_tile(f_p),            # x row block (self term)
                  resident((2 * f_p, h_p)),  # [Wn1; Ws1]
                  resident((1, h_p))],      # b1
        out_specs=row_tile(h_p),
        compiler_params=pltpu.CompilerParams(
            dimension_semantics=("parallel",),
            vmem_limit_bytes=_vmem_limit(step1)),
        cost_estimate=cost1,
    )(adj, inv_deg, x_p, x_p, w1, b1)

    # ---------------- SAGEConv layer 2 + MLP ----------------
    step2 = (tm * n_p * 2 + tm * 4 + n_p * h_p * 2 + tm * h_p * 2
             + 2 * h_p * h_p * 2 + h_p * m_p * 2 + m_p * o_p * 2
             + (h_p + m_p + o_p) * 4 + tm * o_p * 4)
    cost2 = pl.CostEstimate(
        flops=(2 * n_p * n_p * h_p + 2 * n_p * (2 * h_p) * h_p
               + 2 * n_p * h_p * m_p + 2 * n_p * m_p * o_p),
        transcendentals=0,
        bytes_accessed=int(adj.nbytes + inv_deg.nbytes + 2 * h1.nbytes
                           + w2.nbytes + w3.nbytes + w4.nbytes
                           + b2.nbytes + b3.nbytes + b4.nbytes + n_p * o_p * 4))
    out_p = pl.pallas_call(
        _sage_conv2_mlp_kernel,
        out_shape=jax.ShapeDtypeStruct((n_p, o_p), jnp.float32),
        grid=grid,
        in_specs=[row_tile(n_p),            # A row block
                  row_tile(1),              # inv_deg
                  resident((n_p, h_p)),     # full h1 (resident, for aggregation)
                  row_tile(h_p),            # h1 row block (self term)
                  resident((2 * h_p, h_p)),  # [Wn2; Ws2]
                  resident((1, h_p)),       # b2
                  resident((h_p, m_p)),     # W3
                  resident((1, m_p)),       # b3
                  resident((m_p, o_p)),     # W4
                  resident((1, o_p))],      # b4
        out_specs=row_tile(o_p),
        compiler_params=pltpu.CompilerParams(
            dimension_semantics=("parallel",),
            vmem_limit_bytes=_vmem_limit(step2)),
        cost_estimate=cost2,
    )(adj, inv_deg, h1, h1, w2, b2, w3, b3, w4, b4)

    return out_p[:n, :out_dim]


# ---------------------------------------------------------------------------
# Params + pure-JAX f32 reference (for tolerance check)
# ---------------------------------------------------------------------------
def init_params(key, f_in, hidden, mlp_hidden, out_dim):
    ks = jax.random.split(key, 8)

    def lin(k, fan_in, fan_out):
        s = 1.0 / jnp.sqrt(fan_in)
        return jax.random.uniform(k, (fan_in, fan_out), jnp.float32, -s, s)

    return {
        "wn1": lin(ks[0], f_in, hidden),
        "ws1": lin(ks[1], f_in, hidden),
        "b1": jnp.zeros((1, hidden), jnp.float32),
        "wn2": lin(ks[2], hidden, hidden),
        "ws2": lin(ks[3], hidden, hidden),
        "b2": jnp.zeros((1, hidden), jnp.float32),
        "w3": lin(ks[4], hidden, mlp_hidden),
        "b3": jax.random.uniform(ks[5], (1, mlp_hidden), jnp.float32, -0.1, 0.1),
        "w4": lin(ks[6], mlp_hidden, out_dim),
        "b4": jax.random.uniform(ks[7], (1, out_dim), jnp.float32, -0.1, 0.1),
    }


def _reference_forward(x, edge_index, params):
    n = x.shape[0]
    adj = jnp.zeros((n, n), jnp.float32).at[edge_index[1], edge_index[0]].add(1.0)
    deg = jnp.clip(jnp.sum(adj, axis=1, keepdims=True), 1.0, None)
    a = adj / deg
    h1 = jnp.maximum(a @ x @ params["wn1"] + x @ params["ws1"] + params["b1"], 0.0)
    h2 = a @ h1 @ params["wn2"] + h1 @ params["ws2"] + params["b2"]
    m1 = jnp.maximum(h2 @ params["w3"] + params["b3"], 0.0)
    return m1 @ params["w4"] + params["b4"]


if __name__ == "__main__":
    key = jax.random.PRNGKey(0)
    k_x, k_e, k_p = jax.random.split(key, 3)

    N, F_IN, HIDDEN, MLP_HIDDEN, OUT = 16, 32, 32, 32, 8
    E = 48

    x = jax.random.normal(k_x, (N, F_IN), jnp.float32)
    edge_index = jax.random.randint(k_e, (2, E), 0, N, jnp.int32)
    params = init_params(k_p, F_IN, HIDDEN, MLP_HIDDEN, OUT)

    out = graphsage_with_mlp(x, edge_index, params)
    jax.block_until_ready(out)
    assert out.shape == (N, OUT)

    # bf16-MXU / f32-accum result vs. pure f32 reference (tolerance, not exact)
    ref = _reference_forward(x, edge_index, params)
    err = float(jnp.max(jnp.abs(out - ref)))
    scale = float(jnp.max(jnp.abs(ref))) + 1e-6
    assert err / scale < 5e-2, f"mismatch: max_abs_err={err}, ref_scale={scale}"

    print("KERNEL_OK")
</pallas_src>

<mosaic_0001>
module attributes {stable_mosaic.version = 11 : i64} {
  func.func @_sage_conv1_kernel(%arg0: i32, %arg1: memref<16x16xbf16, #tpu.memory_space<vmem>>, %arg2: memref<16x1xf32, #tpu.memory_space<vmem>>, %arg3: memref<16x128xbf16, #tpu.memory_space<vmem>>, %arg4: memref<16x128xbf16, #tpu.memory_space<vmem>>, %arg5: memref<256x128xbf16, #tpu.memory_space<vmem>>, %arg6: memref<1x128xf32, #tpu.memory_space<vmem>>, %arg7: memref<16x128xbf16, #tpu.memory_space<vmem>>) attributes {dimension_semantics = [#tpu.dimension_semantics<parallel>], iteration_bounds = array<i64: 1>, scalar_prefetch = 0 : i64, scratch_operands = 0 : i64, tpu.core_type = #tpu.core_type<tc>, window_params = [{transform_indices = @transform_0, window_bounds = array<i64: 16, 16>}, {transform_indices = @transform_1, window_bounds = array<i64: 16, 1>}, {pipeline_mode = #tpu.pipeline_mode<synchronous>, transform_indices = @transform_2, window_bounds = array<i64: 16, 128>}, {transform_indices = @transform_3, window_bounds = array<i64: 16, 128>}, {pipeline_mode = #tpu.pipeline_mode<synchronous>, transform_indices = @transform_4, window_bounds = array<i64: 256, 128>}, {pipeline_mode = #tpu.pipeline_mode<synchronous>, transform_indices = @transform_5, window_bounds = array<i64: 1, 128>}, {transform_indices = @transform_6, window_bounds = array<i64: 16, 128>}]} {
    %c0 = arith.constant 0 : index
    %c0_0 = arith.constant 0 : index
    %0 = vector.load %arg1[%c0, %c0_0] : memref<16x16xbf16, #tpu.memory_space<vmem>>, vector<16x16xbf16>
    %c0_1 = arith.constant 0 : index
    %c0_2 = arith.constant 0 : index
    %1 = vector.load %arg3[%c0_1, %c0_2] : memref<16x128xbf16, #tpu.memory_space<vmem>>, vector<16x128xbf16>
    %cst = arith.constant dense<0.000000e+00> : vector<16x128xf32>
    %2 = tpu.matmul %0, %1, %cst {dimension_numbers = #tpu.dot_dimension_numbers<[1], [0], [0], [1], [0, 0, 1, 1], [], []>} : vector<16x16xbf16>, vector<16x128xbf16>, vector<16x128xf32> -> vector<16x128xf32>
    %c0_3 = arith.constant 0 : index
    %c0_4 = arith.constant 0 : index
    %3 = vector.load %arg2[%c0_3, %c0_4] : memref<16x1xf32, #tpu.memory_space<vmem>>, vector<16x1xf32>
    %4 = vector.broadcast %3 : vector<16x1xf32> to vector<16x128xf32>
    %5 = arith.mulf %2, %4 : vector<16x128xf32>
    %6 = arith.truncf %5 : vector<16x128xf32> to vector<16x128xbf16>
    %c0_5 = arith.constant 0 : index
    %c0_6 = arith.constant 0 : index
    %7 = vector.load %arg4[%c0_5, %c0_6] : memref<16x128xbf16, #tpu.memory_space<vmem>>, vector<16x128xbf16>
    %8 = tpu.concatenate %6, %7 in 1 : vector<16x128xbf16>, vector<16x128xbf16> -> vector<16x256xbf16>
    %c0_7 = arith.constant 0 : index
    %c0_8 = arith.constant 0 : index
    %9 = vector.load %arg5[%c0_7, %c0_8] : memref<256x128xbf16, #tpu.memory_space<vmem>>, vector<256x128xbf16>
    %cst_9 = arith.constant dense<0.000000e+00> : vector<16x128xf32>
    %10 = tpu.matmul %8, %9, %cst_9 {dimension_numbers = #tpu.dot_dimension_numbers<[1], [0], [0], [1], [0, 0, 1, 1], [], []>} : vector<16x256xbf16>, vector<256x128xbf16>, vector<16x128xf32> -> vector<16x128xf32>
    %c0_10 = arith.constant 0 : index
    %c0_11 = arith.constant 0 : index
    %11 = vector.load %arg6[%c0_10, %c0_11] : memref<1x128xf32, #tpu.memory_space<vmem>>, vector<1x128xf32>
    %12 = vector.broadcast %11 : vector<1x128xf32> to vector<16x128xf32>
    %13 = arith.addf %10, %12 : vector<16x128xf32>
    %cst_12 = arith.constant 0.000000e+00 : f32
    %14 = vector.broadcast %cst_12 : f32 to vector<16x128xf32>
    %15 = arith.maximumf %13, %14 : vector<16x128xf32>
    %16 = arith.truncf %15 : vector<16x128xf32> to vector<16x128xbf16>
    %c0_13 = arith.constant 0 : index
    %c0_14 = arith.constant 0 : index
    %17 = vector.load %arg7[%c0_13, %c0_14] : memref<16x128xbf16, #tpu.memory_space<vmem>>, vector<16x128xbf16>
    tpu.vector_store %arg7[%c0_13, %c0_14], %16 {strides = array<i32>} : memref<16x128xbf16, #tpu.memory_space<vmem>>, vector<16x128xbf16>,
    return
  }
  func.func @transform_0(%arg0: i32) -> (i32, i32) {
    %c0_i32 = arith.constant 0 : i32
    %c0_i32_0 = arith.constant 0 : i32
    return %arg0, %c0_i32 : i32, i32
  }
  func.func @transform_1(%arg0: i32) -> (i32, i32) {
    %c0_i32 = arith.constant 0 : i32
    %c0_i32_0 = arith.constant 0 : i32
    return %arg0, %c0_i32 : i32, i32
  }
  func.func @transform_2(%arg0: i32) -> (i32, i32) {
    %c0_i32 = arith.constant 0 : i32
    %c0_i32_0 = arith.constant 0 : i32
    %c0_i32_1 = arith.constant 0 : i32
    return %c0_i32, %c0_i32_0 : i32, i32
  }
  func.func @transform_3(%arg0: i32) -> (i32, i32) {
    %c0_i32 = arith.constant 0 : i32
    %c0_i32_0 = arith.constant 0 : i32
    return %arg0, %c0_i32 : i32, i32
  }
  func.func @transform_4(%arg0: i32) -> (i32, i32) {
    %c0_i32 = arith.constant 0 : i32
    %c0_i32_0 = arith.constant 0 : i32
    %c0_i32_1 = arith.constant 0 : i32
    return %c0_i32, %c0_i32_0 : i32, i32
  }
  func.func @transform_5(%arg0: i32) -> (i32, i32) {
    %c0_i32 = arith.constant 0 : i32
    %c0_i32_0 = arith.constant 0 : i32
    %c0_i32_1 = arith.constant 0 : i32
    return %c0_i32, %c0_i32_0 : i32, i32
  }
  func.func @transform_6(%arg0: i32) -> (i32, i32) {
    %c0_i32 = arith.constant 0 : i32
    %c0_i32_0 = arith.constant 0 : i32
    return %arg0, %c0_i32 : i32, i32
  }
}

</mosaic_0001>

<bundles_post_ra>
// kernel: tpu_custom_call.1
= control target key start
LH: loop header
LB: loop body
LE: loop exit
PB: predicated region body
PF: predicated region fallthrough
CT: control target
= control target key end

     0   :  { %11 = vsyncpa [#allocation3], 0  ;;  %s567_s0 = inlined_call_operand.vmem [shape: bf16[16,16], index: 0, kind: input, shape index: {}]   ;;  %s568_s1 = inlined_call_operand.vmem [shape: f32[16,1], index: 1, kind: input, shape index: {}]   ;;  %s569_s2 = inlined_call_operand.vmem [shape: bf16[16,128], index: 2, kind: input, shape index: {}]   ;;  %s570_s3 = inlined_call_operand.hbm [shape: bf16[16,128], index: 3, kind: input, shape index: {}]   ;;  %s571_s4 = inlined_call_operand.hbm [shape: bf16[256,128], index: 4, kind: input, shape index: {}]   ;;  %s572_s5 = inlined_call_operand.vmem [shape: f32[1,128], index: 5, kind: input, shape index: {}]   ;;  %s573_s6 = inlined_call_operand.hbm [shape: bf16[16,128], index: 6, kind: output, shape index: {}]  }
   0x1   :  { %12 = vsyncpa [#allocation6], 0 }
   0x2   :  { %13 = vsyncpa [#allocation4], 0  ;;  %s24_s23 = sshll.u32 %s570_s3, 4  ;;  %s493_s24 = smov [#allocation2]   ;;  %s25_s23 = int_to_ptr.hbm [resolvable:$true] %s24_s23 }
   0x3   :  { %s26_s25 = sshll.u32 %s493_s24, 4  ;;  %s37_s28 = sshll.u32 %s571_s4, 4  ;;  %s27_s25 = int_to_ptr.vmem [resolvable:$true] %s26_s25  ;;  %s38_s28 = int_to_ptr.hbm [resolvable:$true] %s37_s28 }
   0x4   :  { %s494_s29 = smov 64   ;;  %s495_s30 = smov 4  }
   0x5   :  { %32 = dma.hbm_to_vmem [thread:$0]  %s25_s23, 128, %s27_s25, [#allocation3], %s494_s29, %s494_s29, %s495_s30  }
   0x6   :  { %s496_s7 = smov [#allocation5]  }
   0x7   :  { %s39_s8 = sshll.u32 %s496_s7, 4  ;;  %s40_s8 = int_to_ptr.vmem [resolvable:$true] %s39_s8 }
   0x8   :  { %45 = dma.hbm_to_vmem [thread:$0]  %s38_s28, 2048, %s40_s8, [#allocation6], %s494_s29, %s494_s29, %s495_s30  }
   0x9   :  { %487 = dma.done.wait [#allocation3], 128  }
   0xa   :  { %488 = vsyncadd [#allocation3], 4294967168 }
   0xb   :  { %489 = dma.done.wait [#allocation6], 2048  }
   0xc   :  { %490 = vsyncadd [#allocation6], 4294965248  ;;  %v497_v0 = vmov 0   ;;  %v384_v1 = vld [vmem:[%s569_s2] sm:$0xff]  ;;  %vm72_vm0 = vcmask 130048   ;;  %v400_v6 = vld [vmem:[#allocation5 + $0x70] sm:$0xff] }
   0xd   :  { %413 = vset.pattern.permute.xlu0 %v497_v0  ;;  %v90_v2 = vld [vmem:[%s568_s1] sm:$0xff]  ;;  %83 = vmatpush.bf16.msra.mxu0 %v384_v1  ;;  %v392_v7 = vld [vmem:[#allocation5 + $0x30] sm:$0xff]  ;;  %v91_v8 = vld [vmem:[%s568_s1 + $0x8] sm:$0xff]  ;;  %s498_s14 = smov [#allocation7]   ;;  %s292_s18 = sshll.u32 %s573_s6, 4  ;;  %s293_s18 = int_to_ptr.hbm [resolvable:$true] %s292_s18 }
   0xe   :  { %v383_v3 = vld [vmem:[%s567_s0] sm:$0xff]  ;;  %94 = vperm.xlu0 %413, %v90_v2   ;;  %v399_v9 = vld [vmem:[#allocation5 + $0x68] sm:$0xff]  ;;  %v398_v10 = vld [vmem:[#allocation5 + $0x60] sm:$0xff]  ;;  %s290_s15 = sshll.u32 %s498_s14, 4  ;;  %s291_s15 = int_to_ptr.vmem [resolvable:$true] %s290_s15 }
   0xf   :  { %v401_v4 = vld [vmem:[#allocation5 + $0x78] sm:$0xff]  ;;  %v391_v12 = vld [vmem:[#allocation5 + $0x28] sm:$0xff]  ;;  %v396_v13 = vld [vmem:[#allocation5 + $0x50] sm:$0xff] }
  0x10   :  { %v393_v5 = vld [vmem:[#allocation5 + $0x38] sm:$0xff]  ;;  %266 = vmatpush.bf16.msra.mxu2 %v401_v4  ;;  %314 = vmatmul.msk.bf16.vlgmr.msra.gmra.mxu0 %vm72_vm0, %v383_v3  ;;  %v390_v14 = vld [vmem:[#allocation5 + $0x20] sm:$0xff]  ;;  %v395_v15 = vld [vmem:[#allocation5 + $0x48] sm:$0xff] }
  0x11   :  { %252 = vmatpush.bf16.msra.mxu1 %v393_v5  ;;  %v397_v11 = vld [vmem:[#allocation5 + $0x58] sm:$0xff]  ;;  %v394_v17 = vld [vmem:[#allocation5 + $0x40] sm:$0xff]  ;;  %v388_v19 = vld [vmem:[#allocation5 + $0x10] sm:$0xff] }
  0x12   :  { %v389_v16 = vld [vmem:[#allocation5 + $0x18] sm:$0xff]  ;;  %v387_v20 = vld [vmem:[#allocation5 + $0x8] sm:$0xff]  ;;  %v386_v21 = vld [vmem:[#allocation5] sm:$0xff] }
  0x13   :  { %v385_v18 = vld [vmem:[#allocation2] sm:$0xff] }
  0x14   :  { %267 = vmatpush.bf16.msra.mxu2 %v400_v6  ;;  %v414_v35 = vld [vmem:[%s572_s5] ss:$0 sm:$0xff] }
  0x15   :  { %253 = vmatpush.bf16.msra.mxu1 %v392_v7 }
  0x16   :  { %99 = vperm.xlu0 %413, %v91_v8  }
  0x18   :  { %268 = vmatpush.bf16.msra.mxu2 %v399_v9 }
  0x19   :  { %254 = vmatpush.bf16.msra.mxu1 %v391_v12 }
  0x1c   :  { %269 = vmatpush.bf16.msra.mxu2 %v398_v10 }
  0x1d   :  { %255 = vmatpush.bf16.msra.mxu1 %v390_v14 }
  0x20   :  { %270 = vmatpush.bf16.msra.mxu2 %v397_v11 }
  0x21   :  { %256 = vmatpush.bf16.msra.mxu1 %v389_v16 }
  0x24   :  { %271 = vmatpush.bf16.msra.mxu2 %v396_v13 }
  0x25   :  { %257 = vmatpush.bf16.msra.mxu1 %v388_v19 }
  0x28   :  { %272 = vmatpush.bf16.msra.mxu2 %v395_v15 }
  0x29   :  { %258 = vmatpush.bf16.msra.mxu1 %v387_v20 }
  0x2c   :  { %273 = vmatpush.bf16.msra.mxu2 %v394_v17 }
  0x2d   :  { %259 = vmatpush.bf16.msra.mxu1 %v386_v21 }
  0x2f   :  { %274 = vmatmul.bf16.vlgmr.msra.gmra.mxu2 %v385_v18 }
  0x80   :  { %v95_v22 = vpop.permute.xlu0 %94 }
  0x88   :  { %v100_v25 = vpop.permute.xlu0 %99 }
  0x8d   :  { %v85_v23 = vpop.f32.mrf.mxu0 }
  0x8e   :  { %v102_v24 = vmul.f32 %v95_v22, %v85_v23 }
  0x90   :  { %v104_v27 = vpack.c.bf16 %v102_v24, %v102_v24 }
  0x92   :  { %v110_v30 = vunpack.c.l.b16 %v104_v27 }
  0x95   :  { %v87_v26 = vpop.f32.mrf.mxu0 }
  0x96   :  { %v103_v28 = vmul.f32 %v100_v25, %v87_v26 }
  0x98   :  { %v105_v29 = vpack.c.bf16 %v103_v28, %v103_v28 }
  0x9a   :  { %v111_v31 = vunpack.c.l.b16 %v105_v29 }
  0x9c   :  { %v112_v32 = vpack.c.b16 %v111_v31, %v110_v30 }
  0x9e   :  { %260 = vmatmul.bf16.vlgmr.msra.gmra.mxu1 %v112_v32 }
  0xb2   :  { %v275_v33 = vpop.f32.mrf.mxu2 }
  0xba   :  { %v277_v40 = vpop.f32.mrf.mxu2 }
 0x11b   :  { %v261_v34 = vpop.f32.mrf.mxu1 }
 0x11c   :  { %v262_v36 = vadd.f32 %v414_v35, %v261_v34 }
 0x11e   :  { %v276_v38 = vadd.f32 %v275_v33, %v262_v36 }
 0x120   :  { %v280_v42 = vmax.f32 %v276_v38, 0.0 }
 0x123   :  { %v263_v37 = vpop.f32.mrf.mxu1 }
 0x124   :  { %v264_v39 = vadd.f32 %v414_v35, %v263_v37 }
 0x126   :  { %v278_v41 = vadd.f32 %v277_v40, %v264_v39 }
 0x128   :  { %v281_v43 = vmax.f32 %v278_v41, 0.0 }
 0x12a   :  { %v405_v44 = vpack.c.bf16 %v281_v43, %v280_v42 }
 0x12c   :  { %406 = vst [vmem:[#allocation7] sm:$0xff] %v405_v44  }
 0x12d   :  { %298 = dma.vmem_to_hbm [thread:$0]  %s291_s15, 128, %s293_s18, [#allocation4], %s494_s29, %s494_s29, %s495_s30  }
 0x12e   :  { %491 = dma.done.wait [#allocation4], 128  }
 0x12f   :  { %492 = vsyncadd [#allocation4], 4294967168 }
 0x130   :  { %303 = vsyncpa [#allocation3], 1 }
 0x131   :  { %304 = vsyncpa [#allocation6], 1 }
 0x132   :  { %305 = vsyncpa [#allocation4], 1 }

</bundles_post_ra>
